<compile_context>
chip_gen: v6e
topology: v6e:2x2x1
jax: 0.10.0
libtpu: 0.0.40
codegen_flags: <defaults>
</compile_context>

<pallas_src>
import jax
import jax.numpy as jnp
from jax.experimental import pallas as pl
from jax.experimental.pallas import tpu as pltpu


def _denoiser_kernel(x_ref, coef_ref, o_ref):
    # x_ref:    (rows_tile, lane_tile) native dtype (f32 / bf16)
    # coef_ref: (rows_tile, 2) f32 -- col 0 = A (scale), col 1 = Bias
    # o_ref:    (rows_tile, lane_tile) native dtype
    x = x_ref[...].astype(jnp.float32)
    a = coef_ref[:, 0:1]          # (rows_tile, 1), broadcast across lanes
    b = coef_ref[:, 1:2]
    o_ref[...] = (x * a + b).astype(o_ref.dtype)


def _vmem_capacity_bytes() -> int:
    try:
        cap = getattr(pltpu.get_tpu_info(), "vmem_capacity_bytes", None)
        if cap:
            return int(cap)
    except Exception:
        pass
    return 64 * 1024 * 1024  # conservative (v7x-sized) default


def _denoiser_pallas(x2, coef):
    """x2: (rows, hw) image view; coef: (rows, 2) f32 per-row (scale, bias)."""
    rows, hw = x2.shape
    elem_bytes = jnp.dtype(x2.dtype).itemsize

    # Generation-aware block budget: ~4 MiB blocks on 128-MiB-VMEM parts
    # (v5e / v6e), ~2 MiB blocks on 64-MiB parts (v7x).
    vmem_cap = _vmem_capacity_bytes()
    big_vmem = vmem_cap >= 100 * 1024 * 1024
    block_budget = (4 if big_vmem else 2) * 1024 * 1024

    # Row tile: full extent when small (exempt from the sublane-multiple rule,
    # handles any B*C without padding); otherwise 256 (a multiple of both 8
    # and 16, so bf16 packed sublanes stay unmasked). Partial tail tiles are
    # handled by Pallas (OOB writes dropped) -- no wrapper pad/slice needed.
    rows_tile = rows if rows <= 256 else 256

    # Lane tile: multiple of 128 sized to the block budget; if hw is not a
    # multiple of 128, a full-extent lane block is exempt from the rule.
    if hw % 128 == 0:
        max_lane = max(128, (block_budget // (elem_bytes * rows_tile)) // 128 * 128)
        lane_tile = min(hw, max_lane)
    else:
        lane_tile = hw

    grid_r = pl.cdiv(rows, rows_tile)
    grid_l = pl.cdiv(hw, lane_tile)

    # Put the longer axis first so the leading "parallel" axis has enough
    # iterations to shard across both TensorCores on v7x.
    if grid_r >= grid_l:
        grid = (grid_r, grid_l)
        img_idx = lambda i, j: (i, j)
        coef_idx = lambda i, j: (i, 0)
    else:
        grid = (grid_l, grid_r)
        img_idx = lambda i, j: (j, i)
        coef_idx = lambda i, j: (j, 0)

    img_spec = pl.BlockSpec((rows_tile, lane_tile), img_idx)
    coef_spec = pl.BlockSpec((rows_tile, 2), coef_idx)

    return pl.pallas_call(
        _denoiser_kernel,
        out_shape=jax.ShapeDtypeStruct((rows, hw), x2.dtype),
        grid=grid,
        in_specs=[img_spec, coef_spec],
        out_specs=img_spec,
        compiler_params=pltpu.CompilerParams(
            dimension_semantics=("parallel", "parallel"),
            vmem_limit_bytes=(64 if big_vmem else 32) * 1024 * 1024,
        ),
    )(x2, coef)


def denoiser_forward(x, sigma, *, sigma_data=1.0, w_gamma, w_beta):
    """Denoiser.forward with a synthetic FiLM inner model.

    x: (B, C, H, W) image (f32 or bf16), sigma: (B,) positive noise levels,
    w_gamma / w_beta: (C,) synthetic inner-model conditioning weights.
    """
    B, C, H, W = x.shape
    sigma = jnp.reshape(sigma, (B,)).astype(jnp.float32)

    # --- Karras scalings (get_scalings) -- tiny, plain JAX ---
    sd = jnp.float32(sigma_data)
    denom = sigma * sigma + sd * sd
    c_skip = (sd * sd) / denom                        # (B,)
    c_out = sigma * sd / jnp.sqrt(denom)              # (B,)
    c_in = 1.0 / jnp.sqrt(denom)                      # (B,)

    # --- synthetic inner-model conditioning (hoisted out of the kernel) ---
    c_noise = jnp.log(sigma) * 0.25                   # (B,)
    gamma = 1.0 + w_gamma.astype(jnp.float32)[None, :] * c_noise[:, None]  # (B, C)
    beta = w_beta.astype(jnp.float32)[None, :] * c_noise[:, None]          # (B, C)

    # Fold everything into a single per-row FMA:
    #   out = ((x*c_in)*gamma + beta)*c_out + x*c_skip
    #       = x * (c_in*gamma*c_out + c_skip) + beta*c_out
    a_bc = c_in[:, None] * gamma * c_out[:, None] + c_skip[:, None]   # (B, C)
    b_bc = beta * c_out[:, None]                                      # (B, C)
    coef = jnp.stack([a_bc.reshape(-1), b_bc.reshape(-1)], axis=-1)   # (B*C, 2) f32

    # Lane-dense (B*C, H*W) view; native dtype for HBM<->VMEM traffic.
    x2 = x.reshape(B * C, H * W)
    out2 = _denoiser_pallas(x2, coef)
    return out2.reshape(B, C, H, W)


def denoiser_forward_ref(x, sigma, *, sigma_data=1.0, w_gamma, w_beta):
    """Pure-JAX reference (same math, f32, un-reassociated)."""
    x32 = x.astype(jnp.float32)
    B = x.shape[0]
    sigma = jnp.reshape(sigma, (B,)).astype(jnp.float32)
    denom = sigma * sigma + sigma_data ** 2
    c_skip = (sigma_data ** 2 / denom)[:, None, None, None]
    c_out = (sigma * sigma_data / jnp.sqrt(denom))[:, None, None, None]
    c_in = (1.0 / jnp.sqrt(denom))[:, None, None, None]
    c_noise = (jnp.log(sigma) * 0.25)[:, None, None, None]
    gamma = 1.0 + w_gamma[None, :, None, None] * c_noise
    beta = w_beta[None, :, None, None] * c_noise
    inner = (x32 * c_in) * gamma + beta
    return (inner * c_out + x32 * c_skip).astype(x.dtype)


if __name__ == "__main__":
    B, C, H, W = 2, 4, 16, 16
    key = jax.random.PRNGKey(0)
    k_x, k_sig, k_g, k_b = jax.random.split(key, 4)

    x = jax.random.normal(k_x, (B, C, H, W), dtype=jnp.float32)
    sigma = jax.random.uniform(k_sig, (B,), dtype=jnp.float32,
                               minval=0.1, maxval=10.0)
    w_gamma = jax.random.normal(k_g, (C,), dtype=jnp.float32) * 0.1
    w_beta = jax.random.normal(k_b, (C,), dtype=jnp.float32) * 0.1

    # f32 path + correctness check against the pure-JAX reference.
    out = denoiser_forward(x, sigma, sigma_data=1.0,
                           w_gamma=w_gamma, w_beta=w_beta)
    ref = denoiser_forward_ref(x, sigma, sigma_data=1.0,
                               w_gamma=w_gamma, w_beta=w_beta)
    jax.block_until_ready((out, ref))
    assert out.shape == (B, C, H, W) and out.dtype == x.dtype
    assert bool(jnp.allclose(out, ref, atol=1e-5, rtol=1e-5)), \
        float(jnp.max(jnp.abs(out - ref)))

    # bf16 path: native-dtype DMA, f32 compute in-kernel, bf16 output.
    x_bf = x.astype(jnp.bfloat16)
    out_bf = denoiser_forward(x_bf, sigma, sigma_data=1.0,
                              w_gamma=w_gamma, w_beta=w_beta)
    ref_bf = denoiser_forward_ref(x_bf, sigma, sigma_data=1.0,
                                  w_gamma=w_gamma, w_beta=w_beta)
    jax.block_until_ready((out_bf, ref_bf))
    assert out_bf.shape == (B, C, H, W) and out_bf.dtype == jnp.bfloat16
    assert bool(jnp.allclose(out_bf.astype(jnp.float32),
                             ref_bf.astype(jnp.float32),
                             atol=2e-2, rtol=2e-2))

    print("KERNEL_OK")
</pallas_src>

<mosaic_0001>
module attributes {stable_mosaic.version = 11 : i64} {
  func.func @_denoiser_kernel(%arg0: i32, %arg1: i32, %arg2: memref<8x256xf32, #tpu.memory_space<vmem>>, %arg3: memref<8x2xf32, #tpu.memory_space<vmem>>, %arg4: memref<8x256xf32, #tpu.memory_space<vmem>>) attributes {dimension_semantics = [#tpu.dimension_semantics<parallel>, #tpu.dimension_semantics<parallel>], iteration_bounds = array<i64: 1, 1>, scalar_prefetch = 0 : i64, scratch_operands = 0 : i64, tpu.core_type = #tpu.core_type<tc>, window_params = [{transform_indices = @transform_0, window_bounds = array<i64: 8, 256>}, {transform_indices = @transform_1, window_bounds = array<i64: 8, 2>}, {transform_indices = @transform_2, window_bounds = array<i64: 8, 256>}]} {
    %c0 = arith.constant 0 : index
    %c0_0 = arith.constant 0 : index
    %0 = vector.load %arg2[%c0, %c0_0] : memref<8x256xf32, #tpu.memory_space<vmem>>, vector<8x256xf32>
    %c0_1 = arith.constant 0 : index
    %c0_2 = arith.constant 0 : index
    %1 = vector.load %arg3[%c0_1, %c0_2] : memref<8x2xf32, #tpu.memory_space<vmem>>, vector<8x1xf32>
    %c0_3 = arith.constant 0 : index
    %c1 = arith.constant 1 : index
    %2 = vector.load %arg3[%c0_3, %c1] : memref<8x2xf32, #tpu.memory_space<vmem>>, vector<8x1xf32>
    %3 = vector.broadcast %1 : vector<8x1xf32> to vector<8x256xf32>
    %4 = arith.mulf %0, %3 : vector<8x256xf32>
    %5 = vector.broadcast %2 : vector<8x1xf32> to vector<8x256xf32>
    %6 = arith.addf %4, %5 : vector<8x256xf32>
    %c0_4 = arith.constant 0 : index
    %c0_5 = arith.constant 0 : index
    %7 = vector.load %arg4[%c0_4, %c0_5] : memref<8x256xf32, #tpu.memory_space<vmem>>, vector<8x256xf32>
    tpu.vector_store %arg4[%c0_4, %c0_5], %6 {strides = array<i32>} : memref<8x256xf32, #tpu.memory_space<vmem>>, vector<8x256xf32>,
    return
  }
  func.func @transform_0(%arg0: i32, %arg1: i32) -> (i32, i32) {
    %c0_i32 = arith.constant 0 : i32
    return %arg0, %arg1 : i32, i32
  }
  func.func @transform_1(%arg0: i32, %arg1: i32) -> (i32, i32) {
    %c0_i32 = arith.constant 0 : i32
    %c0_i32_0 = arith.constant 0 : i32
    return %arg0, %c0_i32 : i32, i32
  }
  func.func @transform_2(%arg0: i32, %arg1: i32) -> (i32, i32) {
    %c0_i32 = arith.constant 0 : i32
    return %arg0, %arg1 : i32, i32
  }
}

</mosaic_0001>

<bundles_post_ra>
// kernel: tpu_custom_call.1
= control target key start
LH: loop header
LB: loop body
LE: loop exit
PB: predicated region body
PF: predicated region fallthrough
CT: control target
= control target key end

     0   :  { %7 = vsyncpa [#allocation3], 0  ;;  %s135_s0 = inlined_call_operand.hbm [shape: f32[8,256], index: 0, kind: input, shape index: {}]   ;;  %s136_s1 = inlined_call_operand.vmem [shape: f32[8,2], index: 1, kind: input, shape index: {}]   ;;  %s137_s2 = inlined_call_operand.hbm [shape: f32[8,256], index: 2, kind: output, shape index: {}]  }
   0x1   :  { %8 = vsyncpa [#allocation4], 0  ;;  %s107_s9 = smov [#allocation2]  }
   0x2   :  { %s15_s10 = sshll.u32 %s107_s9, 4  ;;  %s16_s10 = int_to_ptr.vmem [resolvable:$true] %s15_s10 }
   0x3   :  { %s71_s11 = scalar_lea.vmem %s16_s10, 256  ;;  %p76_p1 = scmp.lt.s32.totalorder %s16_s10, %s16_s10 }
   0x4   :  { %p72_p0 = scmp.ne.s32.totalorder %s16_s10, %s71_s11  ;;  %p77_p2 = scmp.lt.s32.totalorder %s71_s11, %s71_s11 }
   0x6   :  { %p78_p3 = por %p77_p2, %p76_p1 }
   0x8   :  { %p79_p4 = pnand %p78_p3, %p72_p0 }
   0xa   :  { %82 = shalt.err (!%p79_p4)
}
   0xb   :  { %18 = dma.hbm_to_vmem [thread:$0]  %s135_s0, 256, %s16_s10, [#allocation3]  }
   0xc   :  { %103 = dma.done.wait [#allocation3], 256  }
   0xd   :  { %104 = vsyncadd [#allocation3], 4294967040  ;;  %v108_v0 = vmov 0   ;;  %v26_v1 = vld [vmem:[%s136_s1] sm:$0xff]  ;;  %v109_v2 = vmov 1   ;;  %v25_v5 = vld [vmem:[#allocation2 + $0x8] sm:$0xff] }
   0xe   :  { %61 = vset.pattern.permute.xlu0 %v108_v0  ;;  %v24_v4 = vld [vmem:[#allocation2] sm:$0xff]  ;;  %s110_s16 = smov [#allocation5]  }
   0xf   :  { %29 = vperm.xlu0 %61, %v26_v1   ;;  %s48_s17 = sshll.u32 %s110_s16, 4  ;;  %s49_s17 = int_to_ptr.vmem [resolvable:$true] %s48_s17 }
  0x10   :  { %s83_s0 = scalar_lea.vmem %s49_s17, 256  ;;  %p88_p6 = scmp.lt.s32.totalorder %s49_s17, %s49_s17 }
  0x11   :  { %p84_p5 = scmp.ne.s32.totalorder %s49_s17, %s83_s0  ;;  %p89_p7 = scmp.lt.s32.totalorder %s83_s0, %s83_s0 }
  0x13   :  { %62 = vset.pattern.permute.xlu0 %v109_v2  ;;  %p90_p8 = por %p89_p7, %p88_p6 }
  0x14   :  { %35 = vperm.xlu0 %62, %v26_v1  }
  0x15   :  { %p91_p9 = pnand %p90_p8, %p84_p5 }
  0x8a   :  { %v30_v3 = vpop.permute.xlu0 %29 }
  0x8b   :  { %v32_v6 = vmul.f32 %v30_v3, %v24_v4  ;;  %v33_v7 = vmul.f32 %v30_v3, %v25_v5 }
  0x8f   :  { %v36_v8 = vpop.permute.xlu0 %35 }
  0x90   :  { %v38_v9 = vadd.f32 %v36_v8, %v32_v6  ;;  %v39_v10 = vadd.f32 %v36_v8, %v33_v7 }
  0x92   :  { %40 = vst [vmem:[#allocation5] sm:$0xff] %v38_v9  ;;  %41 = vst [vmem:[#allocation5 + $0x8] sm:$0xff] %v39_v10 }
  0x93   :  { %94 = shalt.err (!%p91_p9)
}
  0x94   :  { %51 = dma.vmem_to_hbm [thread:$0]  %s49_s17, 256, %s137_s2, [#allocation4]  }
  0x95   :  { %105 = dma.done.wait [#allocation4], 256  }
  0x96   :  { %106 = vsyncadd [#allocation4], 4294967040 }
  0x97   :  { %55 = vsyncpa [#allocation3], 1 }
  0x98   :  { %56 = vsyncpa [#allocation4], 1 }

</bundles_post_ra>
